<compile_context>
chip_gen: v5e
topology: v5e:2x2
jax: 0.10.0
libtpu: 0.0.40
codegen_flags: <defaults>
</compile_context>

<pallas_src>
import functools

import jax
import jax.numpy as jnp
from jax import lax
from jax.experimental import pallas as pl
from jax.experimental.pallas import tpu as pltpu  # noqa: F401  (kept for CompilerParams use at scale)


# ----------------------------------------------------------------------------
# Pallas kernel: full layer_GCN forward
# ----------------------------------------------------------------------------
def _gcn_kernel(a_ref, ego_ref, cd_ref, ui_out, score_out, *, n_layers, circ_num):
    A = a_ref[...]                       # [N, N] f32
    ego = ego_ref[...]                   # [N, D] f32

    # F.cosine_similarity clamps the *product* of norms at eps=1e-8:
    #   w = dot / max(||x|| * ||ego||, eps)  ==  dot * rsqrt(max(sq_x * sq_ego, eps^2))
    eps2 = jnp.float32(1e-8 * 1e-8)
    ego_sq = jnp.sum(ego * ego, axis=-1, keepdims=True)          # [N, 1], hoisted

    layer = ego
    acc = jnp.zeros_like(ego)
    # Static unroll: n_layers is a compile-time constant (typically 3).
    for _ in range(n_layers):
        # graph propagation (MXU)
        layer = jnp.dot(A, layer, preferred_element_type=jnp.float32)   # [N, D]
        # cosine similarity against ego embeddings (row-wise), rsqrt on EUP
        dotp = jnp.sum(layer * ego, axis=-1, keepdims=True)             # [N, 1]
        layer_sq = jnp.sum(layer * layer, axis=-1, keepdims=True)       # [N, 1]
        w = dotp * lax.rsqrt(jnp.maximum(layer_sq * ego_sq, eps2))      # [N, 1]
        layer = w * layer
        acc = acc + layer

    # One contiguous, lane/sublane-dense store; circ/dis split happens outside.
    ui_out[...] = acc                                                   # [N, D]

    circ = acc[:circ_num, :]             # [C, D]
    dis = acc[circ_num:, :]              # [Dz, D]
    # predict_score = (circ @ re_CD) @ dis^T, without materializing dis.T:
    cw = jnp.dot(circ, cd_ref[...], preferred_element_type=jnp.float32)  # [C, D]
    score_out[...] = lax.dot_general(
        cw, dis, (((1,), (1,)), ((), ())),
        preferred_element_type=jnp.float32)                              # [C, Dz]


def layer_gcn_forward(A_norm, ego_embeddings, re_CD, *,
                      circRNA_num, disease_num, n_layers):
    N, D = ego_embeddings.shape
    assert A_norm.shape == (N, N)
    assert re_CD.shape == (D, D)
    assert N == circRNA_num + disease_num

    kernel = functools.partial(_gcn_kernel, n_layers=n_layers,
                               circ_num=circRNA_num)

    out_shapes = (
        jax.ShapeDtypeStruct((N, D), jnp.float32),                       # ui_all
        jax.ShapeDtypeStruct((circRNA_num, disease_num), jnp.float32),   # score
    )

    ui_all, score = pl.pallas_call(
        kernel,
        out_shape=out_shapes,
        in_specs=[
            pl.BlockSpec((N, N), lambda: (0, 0)),
            pl.BlockSpec((N, D), lambda: (0, 0)),
            pl.BlockSpec((D, D), lambda: (0, 0)),
        ],
        out_specs=(
            pl.BlockSpec((N, D), lambda: (0, 0)),
            pl.BlockSpec((circRNA_num, disease_num), lambda: (0, 0)),
        ),
    )(A_norm.astype(jnp.float32), ego_embeddings.astype(jnp.float32),
      re_CD.astype(jnp.float32))

    # Row split is free in the wrapper (avoids masked partial-store streams in-kernel).
    circ_all = ui_all[:circRNA_num, :]
    dis_all = ui_all[circRNA_num:, :]
    return circ_all, dis_all, score


# ----------------------------------------------------------------------------
# Glue (plain JAX): parameter init + adjacency construction / normalization.
# ----------------------------------------------------------------------------
def xavier_uniform(key, shape):
    fan_in, fan_out = shape[0], shape[1]
    bound = jnp.sqrt(6.0 / (fan_in + fan_out))
    return jax.random.uniform(key, shape, jnp.float32, -bound, bound)


def relations_to_matrix(R, circRNA_num, disease_num):
    # bipartite block adjacency: [[0, R], [R^T, 0]]
    # TODO(synk): `relations_to_matrix` / `re_normalization` are external and
    # undefined in the reference; standard LightGCN-style construction assumed.
    top = jnp.concatenate(
        [jnp.zeros((circRNA_num, circRNA_num), jnp.float32), R], axis=1)
    bot = jnp.concatenate(
        [R.T, jnp.zeros((disease_num, disease_num), jnp.float32)], axis=1)
    return jnp.concatenate([top, bot], axis=0)


def re_normalization(a):
    # symmetric normalization D^{-1/2} A D^{-1/2} with safe divide
    deg = jnp.sum(a, axis=1)
    d_inv_sqrt = jnp.where(deg > 0, 1.0 / jnp.sqrt(deg), 0.0)
    return a * d_inv_sqrt[:, None] * d_inv_sqrt[None, :]


# ----------------------------------------------------------------------------
if __name__ == "__main__":
    circRNA_num, disease_num, latent_dim, n_layers = 24, 16, 32, 3
    N = circRNA_num + disease_num

    key = jax.random.PRNGKey(0)
    k_c, k_d, k_diag, k_rel = jax.random.split(key, 4)

    # deterministic parameter init (matching __init__ shapes / init schemes)
    circ_emb = xavier_uniform(k_c, (circRNA_num, latent_dim))
    dis_emb = xavier_uniform(k_d, (disease_num, latent_dim))
    ego_embeddings = jnp.concatenate([circ_emb, dis_emb], axis=0)        # [N, D]
    # re_CD is a full [D, D] parameter initialized as diag(normal(D)), like the module.
    re_CD = jnp.diag(jax.random.normal(k_diag, (latent_dim,), jnp.float32))

    # synthetic circRNA-disease relation matrix (binary)
    R = (jax.random.uniform(k_rel, (circRNA_num, disease_num)) < 0.3
         ).astype(jnp.float32)

    A_norm = re_normalization(relations_to_matrix(R, circRNA_num, disease_num))

    circ_all, dis_all, score = layer_gcn_forward(
        A_norm, ego_embeddings, re_CD,
        circRNA_num=circRNA_num, disease_num=disease_num, n_layers=n_layers)

    jax.block_until_ready((circ_all, dis_all, score))
    assert circ_all.shape == (circRNA_num, latent_dim)
    assert dis_all.shape == (disease_num, latent_dim)
    assert score.shape == (circRNA_num, disease_num)
    print("KERNEL_OK")
</pallas_src>

<mosaic_0001>
module attributes {stable_mosaic.version = 11 : i64} {
  func.func @_gcn_kernel(%arg0: memref<40x40xf32, #tpu.memory_space<vmem>>, %arg1: memref<40x32xf32, #tpu.memory_space<vmem>>, %arg2: memref<32x32xf32, #tpu.memory_space<vmem>>, %arg3: memref<40x32xf32, #tpu.memory_space<vmem>>, %arg4: memref<24x16xf32, #tpu.memory_space<vmem>>) attributes {dimension_semantics = [], scalar_prefetch = 0 : i64, scratch_operands = 0 : i64, tpu.core_type = #tpu.core_type<tc>} {
    %c0 = arith.constant 0 : index
    %c0_0 = arith.constant 0 : index
    %0 = vector.load %arg0[%c0, %c0_0] : memref<40x40xf32, #tpu.memory_space<vmem>>, vector<40x40xf32>
    %c0_1 = arith.constant 0 : index
    %c0_2 = arith.constant 0 : index
    %1 = vector.load %arg1[%c0_1, %c0_2] : memref<40x32xf32, #tpu.memory_space<vmem>>, vector<40x32xf32>
    %2 = arith.mulf %1, %1 : vector<40x32xf32>
    %cst = arith.constant dense<0.000000e+00> : vector<40xf32>
    %3 = vector.multi_reduction <add>, %2, %cst [1] : vector<40x32xf32> to vector<40xf32>
    %4 = vector.shape_cast %3 : vector<40xf32> to vector<40x1xf32>
    %cst_3 = arith.constant 0.000000e+00 : f32
    %5 = vector.broadcast %cst_3 : f32 to vector<40x32xf32>
    %cst_4 = arith.constant dense<0.000000e+00> : vector<40x32xf32>
    %6 = tpu.matmul %0, %1, %cst_4 {dimension_numbers = #tpu.dot_dimension_numbers<[1], [0], [0], [1], [0, 0, 1, 1], [], []>} : vector<40x40xf32>, vector<40x32xf32>, vector<40x32xf32> -> vector<40x32xf32>
    %7 = arith.mulf %6, %1 : vector<40x32xf32>
    %cst_5 = arith.constant dense<0.000000e+00> : vector<40xf32>
    %8 = vector.multi_reduction <add>, %7, %cst_5 [1] : vector<40x32xf32> to vector<40xf32>
    %9 = vector.shape_cast %8 : vector<40xf32> to vector<40x1xf32>
    %10 = arith.mulf %6, %6 : vector<40x32xf32>
    %cst_6 = arith.constant dense<0.000000e+00> : vector<40xf32>
    %11 = vector.multi_reduction <add>, %10, %cst_6 [1] : vector<40x32xf32> to vector<40xf32>
    %12 = vector.shape_cast %11 : vector<40xf32> to vector<40x1xf32>
    %13 = arith.mulf %12, %4 : vector<40x1xf32>
    %cst_7 = arith.constant 1.000000e-16 : f32
    %14 = vector.broadcast %cst_7 : f32 to vector<40x1xf32>
    %15 = arith.maximumf %13, %14 : vector<40x1xf32>
    %16 = math.rsqrt %15 : vector<40x1xf32>
    %17 = arith.mulf %9, %16 : vector<40x1xf32>
    %18 = vector.broadcast %17 : vector<40x1xf32> to vector<40x32xf32>
    %19 = arith.mulf %18, %6 : vector<40x32xf32>
    %20 = arith.addf %5, %19 : vector<40x32xf32>
    %cst_8 = arith.constant dense<0.000000e+00> : vector<40x32xf32>
    %21 = tpu.matmul %0, %19, %cst_8 {dimension_numbers = #tpu.dot_dimension_numbers<[1], [0], [0], [1], [0, 0, 1, 1], [], []>} : vector<40x40xf32>, vector<40x32xf32>, vector<40x32xf32> -> vector<40x32xf32>
    %22 = arith.mulf %21, %1 : vector<40x32xf32>
    %cst_9 = arith.constant dense<0.000000e+00> : vector<40xf32>
    %23 = vector.multi_reduction <add>, %22, %cst_9 [1] : vector<40x32xf32> to vector<40xf32>
    %24 = vector.shape_cast %23 : vector<40xf32> to vector<40x1xf32>
    %25 = arith.mulf %21, %21 : vector<40x32xf32>
    %cst_10 = arith.constant dense<0.000000e+00> : vector<40xf32>
    %26 = vector.multi_reduction <add>, %25, %cst_10 [1] : vector<40x32xf32> to vector<40xf32>
    %27 = vector.shape_cast %26 : vector<40xf32> to vector<40x1xf32>
    %28 = arith.mulf %27, %4 : vector<40x1xf32>
    %cst_11 = arith.constant 1.000000e-16 : f32
    %29 = vector.broadcast %cst_11 : f32 to vector<40x1xf32>
    %30 = arith.maximumf %28, %29 : vector<40x1xf32>
    %31 = math.rsqrt %30 : vector<40x1xf32>
    %32 = arith.mulf %24, %31 : vector<40x1xf32>
    %33 = vector.broadcast %32 : vector<40x1xf32> to vector<40x32xf32>
    %34 = arith.mulf %33, %21 : vector<40x32xf32>
    %35 = arith.addf %20, %34 : vector<40x32xf32>
    %cst_12 = arith.constant dense<0.000000e+00> : vector<40x32xf32>
    %36 = tpu.matmul %0, %34, %cst_12 {dimension_numbers = #tpu.dot_dimension_numbers<[1], [0], [0], [1], [0, 0, 1, 1], [], []>} : vector<40x40xf32>, vector<40x32xf32>, vector<40x32xf32> -> vector<40x32xf32>
    %37 = arith.mulf %36, %1 : vector<40x32xf32>
    %cst_13 = arith.constant dense<0.000000e+00> : vector<40xf32>
    %38 = vector.multi_reduction <add>, %37, %cst_13 [1] : vector<40x32xf32> to vector<40xf32>
    %39 = vector.shape_cast %38 : vector<40xf32> to vector<40x1xf32>
    %40 = arith.mulf %36, %36 : vector<40x32xf32>
    %cst_14 = arith.constant dense<0.000000e+00> : vector<40xf32>
    %41 = vector.multi_reduction <add>, %40, %cst_14 [1] : vector<40x32xf32> to vector<40xf32>
    %42 = vector.shape_cast %41 : vector<40xf32> to vector<40x1xf32>
    %43 = arith.mulf %42, %4 : vector<40x1xf32>
    %cst_15 = arith.constant 1.000000e-16 : f32
    %44 = vector.broadcast %cst_15 : f32 to vector<40x1xf32>
    %45 = arith.maximumf %43, %44 : vector<40x1xf32>
    %46 = math.rsqrt %45 : vector<40x1xf32>
    %47 = arith.mulf %39, %46 : vector<40x1xf32>
    %48 = vector.broadcast %47 : vector<40x1xf32> to vector<40x32xf32>
    %49 = arith.mulf %48, %36 : vector<40x32xf32>
    %50 = arith.addf %35, %49 : vector<40x32xf32>
    %c0_16 = arith.constant 0 : index
    %c0_17 = arith.constant 0 : index
    %51 = vector.load %arg3[%c0_16, %c0_17] : memref<40x32xf32, #tpu.memory_space<vmem>>, vector<40x32xf32>
    tpu.vector_store %arg3[%c0_16, %c0_17], %50 {strides = array<i32>} : memref<40x32xf32, #tpu.memory_space<vmem>>, vector<40x32xf32>,
    %52 = vector.extract_strided_slice %50 {offsets = [0, 0], sizes = [24, 32], strides = [1, 1]} : vector<40x32xf32> to vector<24x32xf32>
    %53 = vector.extract_strided_slice %50 {offsets = [24, 0], sizes = [16, 32], strides = [1, 1]} : vector<40x32xf32> to vector<16x32xf32>
    %c0_18 = arith.constant 0 : index
    %c0_19 = arith.constant 0 : index
    %54 = vector.load %arg2[%c0_18, %c0_19] : memref<32x32xf32, #tpu.memory_space<vmem>>, vector<32x32xf32>
    %cst_20 = arith.constant dense<0.000000e+00> : vector<24x32xf32>
    %55 = tpu.matmul %52, %54, %cst_20 {dimension_numbers = #tpu.dot_dimension_numbers<[1], [0], [0], [1], [0, 0, 1, 1], [], []>} : vector<24x32xf32>, vector<32x32xf32>, vector<24x32xf32> -> vector<24x32xf32>
    %cst_21 = arith.constant dense<0.000000e+00> : vector<24x16xf32>
    %56 = tpu.matmul %55, %53, %cst_21 {dimension_numbers = #tpu.dot_dimension_numbers<[1], [1], [0], [0], [0, 0, 1, 0], [], []>} : vector<24x32xf32>, vector<16x32xf32>, vector<24x16xf32> -> vector<24x16xf32>
    %c0_22 = arith.constant 0 : index
    %c0_23 = arith.constant 0 : index
    %57 = vector.load %arg4[%c0_22, %c0_23] : memref<24x16xf32, #tpu.memory_space<vmem>>, vector<24x16xf32>
    tpu.vector_store %arg4[%c0_22, %c0_23], %56 {strides = array<i32>} : memref<24x16xf32, #tpu.memory_space<vmem>>, vector<24x16xf32>,
    return
  }
}

</mosaic_0001>

<bundles_post_ra>
// kernel: tpu_custom_call.1
= control target key start
LH: loop header
LB: loop body
LE: loop exit
PB: predicated region body
PF: predicated region fallthrough
CT: control target
= control target key end

     0   :  { %vm47_vm0 = vcmask 326656   ;;  %vm31_vm1 = vcmask 261120   ;;  %s1035_s1 = inlined_call_operand.vmem [shape: f32[40,32], index: 1, kind: input, shape index: {}]   ;;  %s1036_s0 = inlined_call_operand.vmem [shape: f32[40,40], index: 0, kind: input, shape index: {}]   ;;  %s1037_s2 = inlined_call_operand.vmem [shape: f32[32,32], index: 2, kind: input, shape index: {}]   ;;  %s1038_s3 = inlined_call_operand.vmem [shape: f32[40,32], index: 3, kind: output, shape index: {0}]   ;;  %s1039_s4 = inlined_call_operand.vmem [shape: f32[24,16], index: 4, kind: output, shape index: {1}]  }
   0x1   :  { %v682_v0 = vld [vmem:[%s1035_s1 + $0x20] sm:$0xff]  ;;  %v687_v1 = vld [vmem:[%s1035_s1 + $0x18] sm:$0xff]  ;;  %v693_v2 = vld [vmem:[%s1035_s1 + $0x10] sm:$0xff] }
   0x2   :  { %74 = vmatpush.msra.mxu0 %v682_v0  ;;  %v699_v3 = vld [vmem:[%s1035_s1 + $0x8] sm:$0xff]  ;;  %v705_v4 = vld [vmem:[%s1035_s1] sm:$0xff]  ;;  %v726_v7 = vld [vmem:[%s1036_s0 + $0x10] sm:$0xff]  ;;  %v28_v10 = vmul.f32 %v693_v2, %v693_v2  ;;  %v30_v12 = vmul.f32 %v682_v0, %v682_v0  ;;  %v29_v13 = vmul.f32 %v687_v1, %v687_v1 }
   0x3   :  { %v711_v5 = vld [vmem:[%s1036_s0] sm:$0xff]  ;;  %v719_v6 = vld [vmem:[%s1036_s0 + $0x8] sm:$0xff]  ;;  %v733_v8 = vld [vmem:[%s1036_s0 + $0x18] sm:$0xff]  ;;  %v27_v16 = vmul.f32 %v699_v3, %v699_v3  ;;  %v26_v23 = vmul.f32 %v705_v4, %v705_v4 }
   0x4   :  { %75 = vmatpush.msra.mxu0 %v687_v1  ;;  %v740_v9 = vld [vmem:[%s1036_s0 + $0x20] sm:$0xff]  ;;  %v38_v11 = vsel %vm31_vm1, %v28_v10, 0.0  ;;  %v44_v14 = vsel %vm31_vm1, %v30_v12, 0.0  ;;  %v41_v15 = vsel %vm31_vm1, %v29_v13, 0.0 }
   0x5   :  { %39 = vadd.xlane.f32.xlu2 %v38_v11  ;;  %45 = vadd.xlane.f32.xlu0 %v44_v14  ;;  %v35_v17 = vsel %vm31_vm1, %v27_v16, 0.0  ;;  %v32_v25 = vsel %vm31_vm1, %v26_v23, 0.0 }
   0x6   :  { %76 = vmatpush.msra.mxu0 %v693_v2  ;;  %42 = vadd.xlane.f32.xlu1 %v41_v15 }
   0x8   :  { %77 = vmatpush.msra.mxu0 %v699_v3 }
   0xa   :  { %78 = vmatpush.msra.mxu0 %v705_v4 }
   0xb   :  { %601 = vmatmul.msk.f32.vlgmr.msra.gmra.mxu0 %vm47_vm0, %v711_v5 }
   0xd   :  { %36 = vadd.xlane.f32.xlu0 %v35_v17 }
  0x13   :  { %602 = vmatmul.msk.f32.gmra.mxu0 %vm47_vm0, %v719_v6 }
  0x1b   :  { %603 = vmatmul.msk.f32.gmra.mxu0 %vm47_vm0, %v726_v7 }
  0x23   :  { %604 = vmatmul.msk.f32.gmra.mxu0 %vm47_vm0, %v733_v8 }
  0x2b   :  { %605 = vmatmul.msk.f32.gmra.mxu0 %vm47_vm0, %v740_v9 }
  0x78   :  { %v799_v45 = vpop.xlane.xlu2 %39  ;;  %v801_v46 = vpop.xlane.xlu0 %45 }
  0x79   :  { %v803_v47 = vpop.xlane.xlu1 %42 }
  0x80   :  { %v806_v51 = vpop.xlane.xlu0 %36 }
  0x88   :  { %v756_v18 = vpop.f32.mrf.mxu0 }
  0x89   :  { %v95_v36 = vmul.f32 %v756_v18, %v705_v4  ;;  %v115_v37 = vmul.f32 %v756_v18, %v756_v18 }
  0x8b   :  { %v100_v38 = vsel %vm31_vm1, %v95_v36, 0.0  ;;  %v120_v40 = vsel %vm31_vm1, %v115_v37, 0.0 }
  0x90   :  { %v758_v19 = vpop.f32.mrf.mxu0 }
  0x91   :  { %v116_v28 = vmul.f32 %v758_v19, %v758_v19  ;;  %v96_v41 = vmul.f32 %v758_v19, %v699_v3 }
  0x93   :  { %v123_v32 = vsel %vm31_vm1, %v116_v28, 0.0  ;;  %v103_v43 = vsel %vm31_vm1, %v96_v41, 0.0 }
  0x98   :  { %v760_v20 = vpop.f32.mrf.mxu0 }
  0x99   :  { %v117_v21 = vmul.f32 %v760_v20, %v760_v20  ;;  %v97_v42 = vmul.f32 %v760_v20, %v693_v2 }
  0x9b   :  { %v126_v22 = vsel %vm31_vm1, %v117_v21, 0.0  ;;  %v106_v44 = vsel %vm31_vm1, %v97_v42, 0.0 }
  0x9c   :  { %127 = vadd.xlane.f32.xlu2 %v126_v22 }
  0xa0   :  { %v767_v24 = vpop.f32.mrf.mxu0 }
  0xa1   :  { %v118_v26 = vmul.f32 %v767_v24, %v767_v24  ;;  %v98_v29 = vmul.f32 %v767_v24, %v687_v1 }
  0xa3   :  { %v129_v27 = vsel %vm31_vm1, %v118_v26, 0.0  ;;  %v109_v33 = vsel %vm31_vm1, %v98_v29, 0.0 }
  0xa4   :  { %33 = vadd.xlane.f32.xlu2 %v32_v25  ;;  %130 = vadd.xlane.f32.xlu1 %v129_v27 }
  0xa8   :  { %v777_v30 = vpop.f32.mrf.mxu0 }
  0xa9   :  { %v119_v31 = vmul.f32 %v777_v30, %v777_v30  ;;  %v99_v35 = vmul.f32 %v777_v30, %v682_v0 }
  0xab   :  { %v132_v34 = vsel %vm31_vm1, %v119_v31, 0.0  ;;  %v112_v39 = vsel %vm31_vm1, %v99_v35, 0.0 }
  0xac   :  { %124 = vadd.xlane.f32.xlu1 %v123_v32  ;;  %110 = vadd.xlane.f32.xlu2 %v109_v33 }
  0xad   :  { %133 = vadd.xlane.f32.xlu0 %v132_v34 }
  0xb4   :  { %101 = vadd.xlane.f32.xlu2 %v100_v38  ;;  %113 = vadd.xlane.f32.xlu1 %v112_v39 }
  0xb5   :  { %121 = vadd.xlane.f32.xlu0 %v120_v40 }
  0xbc   :  { %104 = vadd.xlane.f32.xlu1 %v103_v43 }
  0xbd   :  { %107 = vadd.xlane.f32.xlu0 %v106_v44 }
 0x10f   :  { %v128_v48 = vpop.xlane.xlu2 %127 }
 0x110   :  { %v137_v49 = vmul.f32 %v128_v48, %v799_v45 }
 0x112   :  { %v142_v50 = vmax.f32 %v137_v49, 1e-16 }
 0x114   :  { %624 = vrsqrt.f32 %v142_v50  ;;  %vm171_vm10 = vweird.f32 %v142_v50 }
 0x117   :  { %v131_v52 = vpop.xlane.xlu1 %130  ;;  %v811_v13 = vpop.xlane.xlu2 %33 }
 0x118   :  { %v138_v53 = vmul.f32 %v131_v52, %v803_v47 }
 0x11a   :  { %v143_v54 = vmax.f32 %v138_v53, 1e-16  ;;  %v625_v56 = vpop.eup %624 }
 0x11b   :  { %v166_v62 = vmul.f32 %v625_v56, %v142_v50  ;;  %vm172_vm7 = vweird.f32 %v625_v56 }
 0x11c   :  { %626 = vrsqrt.f32 %v143_v54  ;;  %vm181_vm3 = vweird.f32 %v143_v54  ;;  %vm173_vm11 = vmor %vm171_vm10, %vm172_vm7 }
 0x11d   :  { %v167_v12 = vmul.f32 %v625_v56, %v166_v62 }
 0x11f   :  { %v125_v55 = vpop.xlane.xlu1 %124  ;;  %v168_v22 = vmul.f32 0.5, %v167_v12  ;;  %v111_v42 = vpop.xlane.xlu2 %110 }
 0x120   :  { %v136_v57 = vmul.f32 %v125_v55, %v806_v51  ;;  %v134_v58 = vpop.xlane.xlu0 %133 }
 0x121   :  { %v139_v59 = vmul.f32 %v134_v58, %v801_v46  ;;  %v169_v32 = vsub.f32 1.5, %v168_v22 }
 0x122   :  { %v627_v60 = vpop.eup %626  ;;  %v141_v61 = vmax.f32 %v136_v57, 1e-16 }
 0x123   :  { %v176_v63 = vmul.f32 %v627_v60, %v143_v54  ;;  %v144_v10 = vmax.f32 %v139_v59, 1e-16  ;;  %vm182_vm2 = vweird.f32 %v627_v60  ;;  %v170_v40 = vmul.f32 %v625_v56, %v169_v32 }
 0x124   :  { %628 = vrsqrt.f32 %v141_v61  ;;  %vm814_vm5 = vmor %vm181_vm3, %vm182_vm2  ;;  %vm161_vm12 = vweird.f32 %v141_v61 }
 0x125   :  { %v177_v11 = vmul.f32 %v627_v60, %v176_v63  ;;  %630 = vrsqrt.f32 %v144_v10  ;;  %vm191_vm6 = vweird.f32 %v144_v10  ;;  %v174_v58 = vsel %vm173_vm11, %v625_v56, %v170_v40 }
 0x127   :  { %v178_v14 = vmul.f32 0.5, %v177_v11  ;;  %v114_v35 = vpop.xlane.xlu1 %113  ;;  %v102_v12 = vpop.xlane.xlu2 %101 }
 0x128   :  { %v122_v15 = vpop.xlane.xlu0 %121 }
 0x129   :  { %v135_v16 = vmul.f32 %v122_v15, %v811_v13  ;;  %v179_v26 = vsub.f32 1.5, %v178_v14 }
 0x12a   :  { %v629_v17 = vpop.eup %628 }
 0x12b   :  { %v631_v21 = vpop.eup %630  ;;  %v156_v23 = vmul.f32 %v629_v17, %v141_v61  ;;  %v140_v25 = vmax.f32 %v135_v16, 1e-16  ;;  %v180_v33 = vmul.f32 %v627_v60, %v179_v26  ;;  %vm162_vm8 = vweird.f32 %v629_v17 }
 0x12c   :  { %v186_v27 = vmul.f32 %v631_v21, %v144_v10  ;;  %vm192_vm4 = vweird.f32 %v631_v21  ;;  %vm163_vm13 = vmor %vm161_vm12, %vm162_vm8 }
 0x12d   :  { %v157_v28 = vmul.f32 %v629_v17, %v156_v23  ;;  %632 = vrsqrt.f32 %v140_v25  ;;  %v184_v41 = vsel %vm814_vm5, %v627_v60, %v180_v33  ;;  %vm193_vm9 = vmor %vm191_vm6, %vm192_vm4  ;;  %vm151_vm15 = vweird.f32 %v140_v25 }
 0x12e   :  { %v187_v29 = vmul.f32 %v631_v21, %v186_v27  ;;  %v198_v54 = vmul.f32 %v184_v41, %v111_v42 }
 0x12f   :  { %v158_v31 = vmul.f32 0.5, %v157_v28  ;;  %v105_v10 = vpop.xlane.xlu1 %104 }
 0x130   :  { %v188_v34 = vmul.f32 0.5, %v187_v29  ;;  %v108_v53 = vpop.xlane.xlu0 %107  ;;  %v826_v11 = vmul.f32 %v198_v54, %v767_v24 }
 0x131   :  { %v159_v36 = vsub.f32 1.5, %v158_v31  ;;  %v197_v62 = vmul.f32 %v174_v58, %v108_v53 }
 0x132   :  { %v189_v37 = vsub.f32 1.5, %v188_v34 }
 0x133   :  { %v633_v38 = vpop.eup %632  ;;  %v160_v48 = vmul.f32 %v629_v17, %v159_v36  ;;  %v830_v56 = vmul.f32 %v197_v62, %v760_v20 }
 0x134   :  { %v146_v43 = vmul.f32 %v633_v38, %v140_v25  ;;  %v190_v44 = vmul.f32 %v631_v21, %v189_v37  ;;  %vm152_vm14 = vweird.f32 %v633_v38 }
 0x135   :  { %v164_v59 = vsel %vm163_vm13, %v629_v17, %v160_v48  ;;  %vm153_vm2 = vmor %vm151_vm15, %vm152_vm14 }
 0x136   :  { %v147_v49 = vmul.f32 %v633_v38, %v146_v43  ;;  %v194_v52 = vsel %vm193_vm9, %v631_v21, %v190_v44  ;;  %v196_v50 = vmul.f32 %v164_v59, %v105_v10 }
 0x137   :  { %v199_v55 = vmul.f32 %v194_v52, %v114_v35 }
 0x138   :  { %v148_v57 = vmul.f32 0.5, %v147_v49  ;;  %v834_v14 = vmul.f32 %v196_v50, %v758_v19 }
 0x139   :  { %v822_v60 = vmul.f32 %v199_v55, %v777_v30 }
 0x13a   :  { %v149_v63 = vsub.f32 1.5, %v148_v57 }
 0x13b   :  { %221 = vmatpush.msra.mxu1 %v822_v60 }
 0x13c   :  { %v150_v61 = vmul.f32 %v633_v38, %v149_v63 }
 0x13d   :  { %222 = vmatpush.msra.mxu1 %v826_v11 }
 0x13e   :  { %v154_v30 = vsel %vm153_vm2, %v633_v38, %v150_v61 }
 0x13f   :  { %223 = vmatpush.msra.mxu1 %v830_v56  ;;  %v195_v15 = vmul.f32 %v154_v30, %v102_v12 }
 0x141   :  { %224 = vmatpush.msra.mxu1 %v834_v14  ;;  %v838_v24 = vmul.f32 %v195_v15, %v756_v18 }
 0x143   :  { %225 = vmatpush.msra.mxu1 %v838_v24 }
 0x144   :  { %606 = vmatmul.msk.f32.vlgmr.msra.gmra.mxu1 %vm47_vm0, %v711_v5 }
 0x14c   :  { %607 = vmatmul.msk.f32.gmra.mxu1 %vm47_vm0, %v719_v6 }
 0x154   :  { %608 = vmatmul.msk.f32.gmra.mxu1 %vm47_vm0, %v726_v7 }
 0x15c   :  { %609 = vmatmul.msk.f32.gmra.mxu1 %vm47_vm0, %v733_v8 }
 0x164   :  { %610 = vmatmul.msk.f32.gmra.mxu1 %vm47_vm0, %v740_v9 }
 0x1c1   :  { %v851_v19 = vpop.f32.mrf.mxu1 }
 0x1c2   :  { %v262_v25 = vmul.f32 %v851_v19, %v851_v19  ;;  %v242_v41 = vmul.f32 %v851_v19, %v705_v4 }
 0x1c4   :  { %v267_v29 = vsel %vm31_vm1, %v262_v25, 0.0  ;;  %v247_v42 = vsel %vm31_vm1, %v242_v41, 0.0 }
 0x1c9   :  { %v853_v18 = vpop.f32.mrf.mxu1 }
 0x1ca   :  { %v263_v34 = vmul.f32 %v853_v18, %v853_v18  ;;  %v243_v35 = vmul.f32 %v853_v18, %v699_v3 }
 0x1cc   :  { %v270_v37 = vsel %vm31_vm1, %v263_v34, 0.0  ;;  %v250_v38 = vsel %vm31_vm1, %v243_v35, 0.0 }
 0x1d1   :  { %v855_v20 = vpop.f32.mrf.mxu1 }
 0x1d2   :  { %v264_v16 = vmul.f32 %v855_v20, %v855_v20  ;;  %v244_v33 = vmul.f32 %v855_v20, %v693_v2 }
 0x1d4   :  { %v273_v17 = vsel %vm31_vm1, %v264_v16, 0.0  ;;  %v253_v36 = vsel %vm31_vm1, %v244_v33, 0.0 }
 0x1d5   :  { %274 = vadd.xlane.f32.xlu2 %v273_v17 }
 0x1d9   :  { %v860_v21 = vpop.f32.mrf.mxu1 }
 0x1da   :  { %v265_v22 = vmul.f32 %v860_v21, %v860_v21  ;;  %v245_v39 = vmul.f32 %v860_v21, %v687_v1 }
 0x1dc   :  { %v276_v23 = vsel %vm31_vm1, %v265_v22, 0.0  ;;  %v256_v40 = vsel %vm31_vm1, %v245_v39, 0.0 }
 0x1dd   :  { %277 = vadd.xlane.f32.xlu1 %v276_v23 }
 0x1e1   :  { %v867_v26 = vpop.f32.mrf.mxu1 }
 0x1e2   :  { %v246_v27 = vmul.f32 %v867_v26, %v682_v0  ;;  %v266_v28 = vmul.f32 %v867_v26, %v867_v26 }
 0x1e4   :  { %v279_v31 = vsel %vm31_vm1, %v266_v28, 0.0  ;;  %v259_v32 = vsel %vm31_vm1, %v246_v27, 0.0 }
 0x1e5   :  { %268 = vadd.xlane.f32.xlu1 %v267_v29  ;;  %280 = vadd.xlane.f32.xlu0 %v279_v31 }
 0x1e6   :  { %260 = vadd.xlane.f32.xlu2 %v259_v32 }
 0x1ed   :  { %254 = vadd.xlane.f32.xlu1 %v253_v36  ;;  %271 = vadd.xlane.f32.xlu0 %v270_v37 }
 0x1ee   :  { %251 = vadd.xlane.f32.xlu2 %v250_v38 }
 0x1f5   :  { %257 = vadd.xlane.f32.xlu0 %v256_v40 }
 0x1fd   :  { %248 = vadd.xlane.f32.xlu0 %v247_v42 }
 0x248   :  { %v275_v43 = vpop.xlane.xlu2 %274 }
 0x249   :  { %v284_v44 = vmul.f32 %v275_v43, %v799_v45 }
 0x24b   :  { %v289_v48 = vmax.f32 %v284_v44, 1e-16 }
 0x24d   :  { %634 = vrsqrt.f32 %v289_v48  ;;  %vm318_vm10 = vweird.f32 %v289_v48 }
 0x250   :  { %v278_v49 = vpop.xlane.xlu1 %277 }
 0x251   :  { %v285_v52 = vmul.f32 %v278_v49, %v803_v47 }
 0x253   :  { %v290_v53 = vmax.f32 %v285_v52, 1e-16  ;;  %v635_v57 = vpop.eup %634 }
 0x254   :  { %v313_v50 = vmul.f32 %v635_v57, %v289_v48  ;;  %vm319_vm5 = vweird.f32 %v635_v57 }
 0x255   :  { %636 = vrsqrt.f32 %v290_v53  ;;  %vm328_vm6 = vweird.f32 %v290_v53  ;;  %vm320_vm11 = vmor %vm318_vm10, %vm319_vm5 }
 0x256   :  { %v314_v30 = vmul.f32 %v635_v57, %v313_v50 }
 0x258   :  { %v269_v54 = vpop.xlane.xlu1 %268  ;;  %v281_v55 = vpop.xlane.xlu0 %280  ;;  %v315_v27 = vmul.f32 0.5, %v314_v30 }
 0x259   :  { %v282_v58 = vmul.f32 %v269_v54, %v811_v13  ;;  %v286_v59 = vmul.f32 %v281_v55, %v801_v46  ;;  %v261_v41 = vpop.xlane.xlu2 %260 }
 0x25a   :  { %v316_v34 = vsub.f32 1.5, %v315_v27 }
 0x25b   :  { %v637_v62 = vpop.eup %636  ;;  %v287_v63 = vmax.f32 %v282_v58, 1e-16  ;;  %v291_v10 = vmax.f32 %v286_v59, 1e-16 }
 0x25c   :  { %v323_v61 = vmul.f32 %v637_v62, %v290_v53  ;;  %vm329_vm3 = vweird.f32 %v637_v62  ;;  %v317_v42 = vmul.f32 %v635_v57, %v316_v34 }
 0x25d   :  { %638 = vrsqrt.f32 %v287_v63  ;;  %vm338_vm7 = vweird.f32 %v291_v10  ;;  %vm330_vm8 = vmor %vm328_vm6, %vm329_vm3  ;;  %vm298_vm14 = vweird.f32 %v287_v63 }
 0x25e   :  { %640 = vrsqrt.f32 %v291_v10  ;;  %v324_v12 = vmul.f32 %v637_v62, %v323_v61  ;;  %v321_v50 = vsel %vm320_vm11, %v635_v57, %v317_v42  ;;  %v512_v42 = vld [vmem:[%s1037_s2 + $0x18] sm:$0xff] }
 0x25f   :  { %534 = vmatpush.msra.mxu3 %v512_v42 }
 0x260   :  { %v272_v15 = vpop.xlane.xlu0 %271  ;;  %v325_v22 = vmul.f32 0.5, %v324_v12  ;;  %v255_v49 = vpop.xlane.xlu1 %254 }
 0x261   :  { %v283_v16 = vmul.f32 %v272_v15, %v806_v51  ;;  %v344_v30 = vmul.f32 %v321_v50, %v255_v49 }
 0x262   :  { %v326_v33 = vsub.f32 1.5, %v325_v22  ;;  %v252_v22 = vpop.xlane.xlu2 %251 }
 0x263   :  { %v639_v17 = vpop.eup %638  ;;  %v288_v23 = vmax.f32 %v283_v16, 1e-16  ;;  %v905_v27 = vmul.f32 %v344_v30, %v855_v20 }
 0x264   :  { %v641_v25 = vpop.eup %640  ;;  %v293_v28 = vmul.f32 %v639_v17, %v287_v63  ;;  %v327_v40 = vmul.f32 %v637_v62, %v326_v33  ;;  %vm299_vm12 = vweird.f32 %v639_v17 }
 0x265   :  { %v333_v29 = vmul.f32 %v641_v25, %v291_v10  ;;  %642 = vrsqrt.f32 %v288_v23  ;;  %vm339_vm4 = vweird.f32 %v641_v25  ;;  %vm308_vm15 = vweird.f32 %v288_v23  ;;  %vm300_vm2 = vmor %vm298_vm14, %vm299_vm12 }
 0x266   :  { %v294_v31 = vmul.f32 %v639_v17, %v293_v28  ;;  %vm340_vm9 = vmor %vm338_vm7, %vm339_vm4  ;;  %v331_v58 = vsel %vm330_vm8, %v637_v62, %v327_v40 }
 0x267   :  { %v334_v32 = vmul.f32 %v641_v25, %v333_v29 }
 0x268   :  { %v295_v36 = vmul.f32 0.5, %v294_v31  ;;  %v258_v37 = vpop.xlane.xlu0 %257 }
 0x269   :  { %v335_v35 = vmul.f32 0.5, %v334_v32  ;;  %v345_v12 = vmul.f32 %v331_v58, %v258_v37 }
 0x26a   :  { %v296_v54 = vsub.f32 1.5, %v295_v36 }
 0x26b   :  { %v643_v38 = vpop.eup %642  ;;  %v336_v39 = vsub.f32 1.5, %v335_v35  ;;  %v901_v62 = vmul.f32 %v345_v12, %v860_v21 }
 0x26c   :  { %v303_v43 = vmul.f32 %v643_v38, %v288_v23  ;;  %vm309_vm13 = vweird.f32 %v643_v38  ;;  %v297_v53 = vmul.f32 %v639_v17, %v296_v54 }
 0x26d   :  { %v337_v44 = vmul.f32 %v641_v25, %v336_v39  ;;  %vm310_vm3 = vmor %vm308_vm15, %vm309_vm13 }
 0x26e   :  { %v304_v52 = vmul.f32 %v643_v38, %v303_v43  ;;  %v510_v43 = vld [vmem:[%s1037_s2 + $0x8] sm:$0xff] }
 0x26f   :  { %v341_v55 = vsel %vm340_vm9, %v641_v25, %v337_v44  ;;  %v301_v25 = vsel %vm300_vm2, %v639_v17, %v297_v53 }
 0x270   :  { %v346_v59 = vmul.f32 %v341_v55, %v261_v41  ;;  %v305_v61 = vmul.f32 0.5, %v304_v52  ;;  %v249_v16 = vpop.xlane.xlu0 %248 }
 0x271   :  { %v342_v63 = vmul.f32 %v301_v25, %v249_v16 }
 0x272   :  { %v306_v15 = vsub.f32 1.5, %v305_v61  ;;  %v897_v10 = vmul.f32 %v346_v59, %v867_v26 }
 0x273   :  { %v913_v21 = vmul.f32 %v342_v63, %v851_v19 }
 0x274   :  { %v307_v48 = vmul.f32 %v643_v38, %v306_v15  ;;  %368 = vmatpush.msra.mxu2 %v897_v10 }
 0x276   :  { %v311_v57 = vsel %vm310_vm3, %v643_v38, %v307_v48  ;;  %369 = vmatpush.msra.mxu2 %v901_v62 }
 0x277   :  { %v343_v26 = vmul.f32 %v311_v57, %v252_v22 }
 0x278   :  { %370 = vmatpush.msra.mxu2 %v905_v27 }
 0x279   :  { %v909_v23 = vmul.f32 %v343_v26, %v853_v18 }
 0x27b   :  { %371 = vmatpush.msra.mxu2 %v909_v23 }
 0x27d   :  { %372 = vmatpush.msra.mxu2 %v913_v21 }
 0x27e   :  { %611 = vmatmul.msk.f32.vlgmr.msra.gmra.mxu2 %vm47_vm0, %v711_v5 }
 0x286   :  { %612 = vmatmul.msk.f32.gmra.mxu2 %vm47_vm0, %v719_v6 }
 0x28e   :  { %613 = vmatmul.msk.f32.gmra.mxu2 %vm47_vm0, %v726_v7 }
 0x296   :  { %614 = vmatmul.msk.f32.gmra.mxu2 %vm47_vm0, %v733_v8 }
 0x29e   :  { %615 = vmatmul.msk.f32.gmra.mxu2 %vm47_vm0, %v740_v9 }
 0x301   :  { %v926_v18 = vpop.f32.mrf.mxu2 }
 0x302   :  { %v409_v19 = vmul.f32 %v926_v18, %v926_v18  ;;  %v389_v5 = vmul.f32 %v926_v18, %v705_v4 }
 0x304   :  { %v414_v20 = vsel %vm31_vm1, %v409_v19, 0.0  ;;  %v394_v8 = vsel %vm31_vm1, %v389_v5, 0.0  ;;  %v352_v5 = vadd.f32 %v913_v21, %v838_v24 }
 0x305   :  { %415 = vadd.xlane.f32.xlu1 %v414_v20 }
 0x309   :  { %v933_v6 = vpop.f32.mrf.mxu2 }
 0x30a   :  { %v410_v7 = vmul.f32 %v933_v6, %v933_v6  ;;  %v390_v17 = vmul.f32 %v933_v6, %v699_v3 }
 0x30c   :  { %v417_v9 = vsel %vm31_vm1, %v410_v7, 0.0  ;;  %v397_v4 = vsel %vm31_vm1, %v390_v17, 0.0 }
 0x30d   :  { %395 = vadd.xlane.f32.xlu1 %v394_v8  ;;  %418 = vadd.xlane.f32.xlu2 %v417_v9 }
 0x311   :  { %v941_v28 = vpop.f32.mrf.mxu2 }
 0x312   :  { %v411_v29 = vmul.f32 %v941_v28, %v941_v28  ;;  %v391_v32 = vmul.f32 %v941_v28, %v693_v2 }
 0x314   :  { %v420_v31 = vsel %vm31_vm1, %v411_v29, 0.0  ;;  %v400_v3 = vsel %vm31_vm1, %v391_v32, 0.0 }
 0x315   :  { %398 = vadd.xlane.f32.xlu2 %v397_v4  ;;  %421 = vadd.xlane.f32.xlu0 %v420_v31 }
 0x319   :  { %v949_v33 = vpop.f32.mrf.mxu2 }
 0x31a   :  { %v412_v34 = vmul.f32 %v949_v33, %v949_v33  ;;  %v392_v40 = vmul.f32 %v949_v33, %v687_v1  ;;  %v509_v1 = vld [vmem:[%s1037_s2] sm:$0xff] }
 0x31c   :  { %v423_v35 = vsel %vm31_vm1, %v412_v34, 0.0  ;;  %v403_v41 = vsel %vm31_vm1, %v392_v40, 0.0  ;;  %v353_v34 = vadd.f32 %v909_v23, %v834_v14 }
 0x31d   :  { %401 = vadd.xlane.f32.xlu0 %v400_v3  ;;  %424 = vadd.xlane.f32.xlu2 %v423_v35 }
 0x321   :  { %v955_v36 = vpop.f32.mrf.mxu2 }
 0x322   :  { %v393_v37 = vmul.f32 %v955_v36, %v682_v0  ;;  %v413_v38 = vmul.f32 %v955_v36, %v955_v36  ;;  %v511_v0 = vld [vmem:[%s1037_s2 + $0x10] sm:$0xff] }
 0x323   :  { %535 = vmatpush.msra.mxu3 %v511_v0  ;;  %v354_v0 = vadd.f32 %v905_v27, %v830_v56 }
 0x324   :  { %v426_v2 = vsel %vm31_vm1, %v413_v38, 0.0  ;;  %v406_v39 = vsel %vm31_vm1, %v393_v37, 0.0 }
 0x325   :  { %427 = vadd.xlane.f32.xlu1 %v426_v2  ;;  %407 = vadd.xlane.f32.xlu0 %v406_v39 }
 0x326   :  { %536 = vmatpush.msra.mxu3 %v510_v43 }
 0x328   :  { %537 = vmatpush.msra.mxu3 %v509_v1 }
 0x32d   :  { %404 = vadd.xlane.f32.xlu1 %v403_v41 }
 0x378   :  { %v416_v44 = vpop.xlane.xlu1 %415 }
 0x379   :  { %v429_v49 = vmul.f32 %v416_v44, %v811_v13 }
 0x37b   :  { %v434_v52 = vmax.f32 %v429_v49, 1e-16 }
 0x37d   :  { %644 = vrsqrt.f32 %v434_v52  ;;  %vm445_vm4 = vweird.f32 %v434_v52 }
 0x380   :  { %v419_v54 = vpop.xlane.xlu2 %418  ;;  %v396_v25 = vpop.xlane.xlu1 %395 }
 0x381   :  { %v430_v55 = vmul.f32 %v419_v54, %v806_v51 }
 0x383   :  { %v645_v58 = vpop.eup %644  ;;  %v435_v59 = vmax.f32 %v430_v55, 1e-16 }
 0x384   :  { %v440_v50 = vmul.f32 %v645_v58, %v434_v52  ;;  %vm446_vm0 = vweird.f32 %v645_v58 }
 0x385   :  { %646 = vrsqrt.f32 %v435_v59  ;;  %vm447_vm5 = vmor %vm445_vm4, %vm446_vm0  ;;  %vm455_vm7 = vweird.f32 %v435_v59  ;;  %vm589_vm0 = vcmask 130048  }
 0x386   :  { %v441_v61 = vmul.f32 %v645_v58, %v440_v50 }
 0x388   :  { %v442_v12 = vmul.f32 0.5, %v441_v61  ;;  %v399_v30 = vpop.xlane.xlu2 %398  ;;  %v422_v15 = vpop.xlane.xlu0 %421 }
 0x389   :  { %v431_v53 = vmul.f32 %v422_v15, %v799_v45 }
 0x38a   :  { %v443_v48 = vsub.f32 1.5, %v442_v12 }
 0x38b   :  { %v647_v16 = vpop.eup %646  ;;  %v436_v57 = vmax.f32 %v431_v53, 1e-16 }
 0x38c   :  { %v444_v13 = vmul.f32 %v645_v58, %v443_v48  ;;  %v450_v22 = vmul.f32 %v647_v16, %v435_v59  ;;  %vm456_vm6 = vweird.f32 %v647_v16  ;;  %v355_v59 = vadd.f32 %v901_v62, %v826_v11 }
 0x38d   :  { %648 = vrsqrt.f32 %v436_v57  ;;  %vm457_vm8 = vmor %vm455_vm7, %vm456_vm6  ;;  %vm465_vm10 = vweird.f32 %v436_v57 }
 0x38e   :  { %v448_v51 = vsel %vm447_vm5, %v645_v58, %v444_v13  ;;  %v451_v26 = vmul.f32 %v647_v16, %v450_v22 }
 0x38f   :  { %v489_v63 = vmul.f32 %v448_v51, %v396_v25 }
 0x390   :  { %v452_v19 = vmul.f32 0.5, %v451_v26  ;;  %v425_v20 = vpop.xlane.xlu2 %424  ;;  %v402_v23 = vpop.xlane.xlu0 %401 }
 0x391   :  { %v494_v45 = vmul.f32 %v489_v63, %v926_v18  ;;  %v432_v7 = vmul.f32 %v425_v20, %v803_v47 }
 0x392   :  { %v453_v8 = vsub.f32 1.5, %v452_v19 }
 0x393   :  { %v649_v9 = vpop.eup %648  ;;  %v437_v17 = vmax.f32 %v432_v7, 1e-16  ;;  %v499_v29 = vadd.f32 %v494_v45, %v352_v5 }
 0x394   :  { %v454_v4 = vmul.f32 %v647_v16, %v453_v8  ;;  %v460_v31 = vmul.f32 %v649_v9, %v436_v57  ;;  %vm466_vm9 = vweird.f32 %v649_v9 }
 0x395   :  { %650 = vrsqrt.f32 %v437_v17  ;;  %504 = vst.msk [vmem:[%s1038_s3] sm:$0xff] %vm31_vm1, %v499_v29  ;;  %616 = vmatmul.msk.f32.vlgmr.msra.gmra.mxu3 %vm31_vm1, %v499_v29  ;;  %vm467_vm11 = vmor %vm465_vm10, %vm466_vm9  ;;  %vm475_vm13 = vweird.f32 %v437_v17 }
 0x396   :  { %v458_v24 = vsel %vm457_vm8, %v647_v16, %v454_v4  ;;  %v461_v21 = vmul.f32 %v649_v9, %v460_v31  ;;  %v356_v16 = vadd.f32 %v897_v10, %v822_v60 }
 0x397   :  { %v490_v47 = vmul.f32 %v458_v24, %v399_v30 }
 0x398   :  { %v462_v18 = vmul.f32 0.5, %v461_v21  ;;  %v428_v32 = vpop.xlane.xlu1 %427  ;;  %v408_v15 = vpop.xlane.xlu0 %407 }
 0x399   :  { %v495_v3 = vmul.f32 %v490_v47, %v933_v6  ;;  %v433_v35 = vmul.f32 %v428_v32, %v801_v46 }
 0x39a   :  { %v463_v37 = vsub.f32 1.5, %v462_v18 }
 0x39b   :  { %v651_v38 = vpop.eup %650  ;;  %v438_v2 = vmax.f32 %v433_v35, 1e-16  ;;  %v500_v39 = vadd.f32 %v495_v3, %v353_v34 }
 0x39c   :  { %v464_v40 = vmul.f32 %v649_v9, %v463_v37  ;;  %v470_v41 = vmul.f32 %v651_v38, %v437_v17  ;;  %vm476_vm12 = vweird.f32 %v651_v38 }
 0x39d   :  { %652 = vrsqrt.f32 %v438_v2  ;;  %505 = vst.msk [vmem:[%s1038_s3 + $0x8] sm:$0xff] %vm31_vm1, %v500_v39  ;;  %617 = vmatmul.msk.f32.gmra.mxu3 %vm31_vm1, %v500_v39  ;;  %vm477_vm14 = vmor %vm475_vm13, %vm476_vm12  ;;  %vm485_vm2 = vweird.f32 %v438_v2 }
 0x39e   :  { %v468_v14 = vsel %vm467_vm11, %v649_v9, %v464_v40  ;;  %v471_v46 = vmul.f32 %v651_v38, %v470_v41 }
 0x39f   :  { %v491_v6 = vmul.f32 %v468_v14, %v402_v23 }
 0x3a0   :  { %v472_v42 = vmul.f32 0.5, %v471_v46  ;;  %v405_v55 = vpop.xlane.xlu1 %404 }
 0x3a1   :  { %v496_v43 = vmul.f32 %v491_v6, %v941_v28 }
 0x3a2   :  { %v473_v1 = vsub.f32 1.5, %v472_v42 }
 0x3a3   :  { %v653_v44 = vpop.eup %652  ;;  %v501_v49 = vadd.f32 %v496_v43, %v354_v0 }
 0x3a4   :  { %v480_v52 = vmul.f32 %v653_v44, %v438_v2  ;;  %v474_v54 = vmul.f32 %v651_v38, %v473_v1  ;;  %vm486_vm15 = vweird.f32 %v653_v44 }
 0x3a5   :  { %506 = vst.msk [vmem:[%s1038_s3 + $0x10] sm:$0xff] %vm31_vm1, %v501_v49  ;;  %618 = vmatmul.msk.f32.gmra.mxu3 %vm31_vm1, %v501_v49  ;;  %vm487_vm3 = vmor %vm485_vm2, %vm486_vm15 }
 0x3a6   :  { %v481_v58 = vmul.f32 %v653_v44, %v480_v52  ;;  %v478_v56 = vsel %vm477_vm14, %v651_v38, %v474_v54 }
 0x3a7   :  { %v492_v27 = vmul.f32 %v478_v56, %v405_v55 }
 0x3a8   :  { %v482_v28 = vmul.f32 0.5, %v481_v58 }
 0x3a9   :  { %v497_v50 = vmul.f32 %v492_v27, %v949_v33 }
 0x3aa   :  { %v483_v61 = vsub.f32 1.5, %v482_v28 }
 0x3ab   :  { %v502_v12 = vadd.f32 %v497_v50, %v355_v59 }
 0x3ac   :  { %v484_v30 = vmul.f32 %v653_v44, %v483_v61 }
 0x3ad   :  { %507 = vst.msk [vmem:[%s1038_s3 + $0x18] sm:$0xff] %vm31_vm1, %v502_v12 }
 0x3ae   :  { %v488_v53 = vsel %vm487_vm3, %v653_v44, %v484_v30 }
 0x3af   :  { %v493_v48 = vmul.f32 %v488_v53, %v408_v15 }
 0x3b1   :  { %v498_v11 = vmul.f32 %v493_v48, %v955_v36 }
 0x3b3   :  { %v503_v62 = vadd.f32 %v498_v11, %v356_v16 }
 0x3b5   :  { %508 = vst.msk [vmem:[%s1038_s3 + $0x20] sm:$0xff] %vm31_vm1, %v503_v62  ;;  %619 = vmatpush.xpose.msk.msrb.mxu3 %vm31_vm1, %v503_v62 }
 0x3b9   :  { %620 = vmatpush.xpose.msk.msrb.mxu3 %vm31_vm1, %v502_v12 }
 0x418   :  { %v539_v33 = vpop.f32.mrf.mxu3 }
 0x419   :  { %621 = vmatmul.msk.f32.vlgmr.msrb.gmra.mxu3 %vm31_vm1, %v539_v33 }
 0x420   :  { %v542_v57 = vpop.f32.mrf.mxu3 }
 0x421   :  { %622 = vmatmul.msk.f32.gmra.mxu3 %vm31_vm1, %v542_v57 }
 0x428   :  { %v545_v13 = vpop.f32.mrf.mxu3 }
 0x429   :  { %623 = vmatmul.msk.f32.gmra.mxu3 %vm31_vm1, %v545_v13 }
 0x49c   :  { %v580_v60 = vpop.f32.mrf.mxu3 }
 0x49d   :  { %590 = vst.msk [vmem:[%s1039_s4] sm:$0xff] %vm589_vm0, %v580_v60 }
 0x4a4   :  { %v583_v10 = vpop.f32.mrf.mxu3 }
 0x4a5   :  { %591 = vst.msk [vmem:[%s1039_s4 + $0x8] sm:$0xff] %vm589_vm0, %v583_v10 }
 0x4ac   :  { %v586_v36 = vpop.f32.mrf.mxu3 }
 0x4ad   :  { %592 = vst.msk [vmem:[%s1039_s4 + $0x10] sm:$0xff] %vm589_vm0, %v586_v36 }

</bundles_post_ra>
